<compile_context>
chip_gen: v7x
topology: tpu7x:2x2x1
jax: 0.10.0
libtpu: 0.0.40
codegen_flags: <defaults>
</compile_context>

<pallas_src>
import jax
import jax.numpy as jnp
from jax.experimental import pallas as pl
from jax.experimental.pallas import tpu as pltpu


def mod_relu_kernel(real_ref, imag_ref, b_ref, out_r_ref, out_i_ref):
    re = real_ref[...]
    im = imag_ref[...]
    b = b_ref[...]                              # (BR, 1), broadcasts over lanes

    mag = jnp.sqrt(re * re + im * im)
    new_mag = jnp.maximum(mag + b, 0.0)         # F.relu(mag + b)

    nonzero = mag > 0.0
    safe = jnp.where(nonzero, mag, 1.0)
    inv = pl.reciprocal(safe, approx=False)     # one EUP reciprocal, no divides
    scale = new_mag * inv

    # mag == 0  =>  atan2(0,0) = 0  =>  cos = 1, sin = 0
    out_r_ref[...] = jnp.where(nonzero, scale * re, new_mag)
    out_i_ref[...] = jnp.where(nonzero, scale * im, 0.0)


def _pick_block(dim, target, align):
    """Largest `align`-multiple divisor of `dim` that is <= target; else `dim`."""
    if dim <= target:
        return dim
    b = (target // align) * align
    while b >= align:
        if dim % b == 0:
            return b
        b -= align
    return dim  # full dim is always a legal block shape


def mod_relu(real, imag, b):
    """Apply modReLU to a complex tensor given as (real, imag) in NCHW layout."""
    N, C, H, W = real.shape
    assert b.shape == (C,)

    R = N * C            # rows (sublane-major axis)
    L = H * W            # lanes (fast axis)

    real2 = real.reshape(R, L)
    imag2 = imag.reshape(R, L)
    # Per-row bias column: row index = n*C + c  ->  bias = b[c]
    b_rows = jnp.tile(b, N).reshape(R, 1).astype(real.dtype)

    # Lane-dense blocks: up to 2048 lanes, ~2 MiB per data block.
    BL = _pick_block(L, 2048, 128)
    target_rows = max(8, (((2 << 20) // (4 * BL)) // 8) * 8)
    BR = _pick_block(R, target_rows, 8)

    grid = (R // BR, L // BL)

    data_spec = pl.BlockSpec((BR, BL), lambda i, j: (i, j))
    bias_spec = pl.BlockSpec((BR, 1), lambda i, j: (i, 0))

    out_r, out_i = pl.pallas_call(
        mod_relu_kernel,
        out_shape=(
            jax.ShapeDtypeStruct((R, L), real.dtype),
            jax.ShapeDtypeStruct((R, L), real.dtype),
        ),
        grid=grid,
        in_specs=[data_spec, data_spec, bias_spec],
        out_specs=(data_spec, data_spec),
        compiler_params=pltpu.CompilerParams(
            dimension_semantics=("parallel", "parallel"),
            vmem_limit_bytes=48 * 1024 * 1024,
        ),
    )(real2, imag2, b_rows)

    return out_r.reshape(N, C, H, W), out_i.reshape(N, C, H, W)


def mod_relu_reference(real, imag, b):
    """Pure-JAX reference matching the PyTorch forward exactly."""
    mag = jnp.sqrt(real ** 2 + imag ** 2)
    phase = jnp.arctan2(imag, real)
    mag = jax.nn.relu(mag + b[None, :, None, None])
    return mag * jnp.cos(phase), mag * jnp.sin(phase)


if __name__ == "__main__":
    N, C, H, W = 2, 4, 16, 16

    key = jax.random.PRNGKey(0)
    k_re, k_im, k_b = jax.random.split(key, 3)

    real = jax.random.normal(k_re, (N, C, H, W), dtype=jnp.float32)
    imag = jax.random.normal(k_im, (N, C, H, W), dtype=jnp.float32)

    # PyTorch init is b = zeros(channels); also test a nonzero bias so the
    # per-channel broadcast actually participates.
    b_zero = jnp.zeros((C,), dtype=jnp.float32)
    b = 0.1 * jax.random.normal(k_b, (C,), dtype=jnp.float32)

    for bias in (b_zero, b):
        out_r, out_i = mod_relu(real, imag, bias)
        out_r = jax.block_until_ready(out_r)
        out_i = jax.block_until_ready(out_i)

        ref_r, ref_i = mod_relu_reference(real, imag, bias)
        assert jnp.allclose(out_r, ref_r, atol=1e-5, rtol=1e-5)
        assert jnp.allclose(out_i, ref_i, atol=1e-5, rtol=1e-5)

    print("KERNEL_OK")
</pallas_src>

<mosaic_0001>
module attributes {stable_mosaic.version = 11 : i64} {
  func.func @mod_relu_kernel(%arg0: i32, %arg1: i32, %arg2: memref<8x256xf32, #tpu.memory_space<vmem>>, %arg3: memref<8x256xf32, #tpu.memory_space<vmem>>, %arg4: memref<8x1xf32, #tpu.memory_space<vmem>>, %arg5: memref<8x256xf32, #tpu.memory_space<vmem>>, %arg6: memref<8x256xf32, #tpu.memory_space<vmem>>) attributes {dimension_semantics = [#tpu.dimension_semantics<parallel>, #tpu.dimension_semantics<parallel>], iteration_bounds = array<i64: 1, 1>, scalar_prefetch = 0 : i64, scratch_operands = 0 : i64, tpu.core_type = #tpu.core_type<tc>, window_params = [{transform_indices = @transform_0, window_bounds = array<i64: 8, 256>}, {transform_indices = @transform_1, window_bounds = array<i64: 8, 256>}, {transform_indices = @transform_2, window_bounds = array<i64: 8, 1>}, {transform_indices = @transform_3, window_bounds = array<i64: 8, 256>}, {transform_indices = @transform_4, window_bounds = array<i64: 8, 256>}]} {
    %c0 = arith.constant 0 : index
    %c0_0 = arith.constant 0 : index
    %0 = vector.load %arg2[%c0, %c0_0] : memref<8x256xf32, #tpu.memory_space<vmem>>, vector<8x256xf32>
    %c0_1 = arith.constant 0 : index
    %c0_2 = arith.constant 0 : index
    %1 = vector.load %arg3[%c0_1, %c0_2] : memref<8x256xf32, #tpu.memory_space<vmem>>, vector<8x256xf32>
    %c0_3 = arith.constant 0 : index
    %c0_4 = arith.constant 0 : index
    %2 = vector.load %arg4[%c0_3, %c0_4] : memref<8x1xf32, #tpu.memory_space<vmem>>, vector<8x1xf32>
    %3 = arith.mulf %0, %0 : vector<8x256xf32>
    %4 = arith.mulf %1, %1 : vector<8x256xf32>
    %5 = arith.addf %3, %4 : vector<8x256xf32>
    %6 = math.sqrt %5 : vector<8x256xf32>
    %7 = vector.broadcast %2 : vector<8x1xf32> to vector<8x256xf32>
    %8 = arith.addf %6, %7 : vector<8x256xf32>
    %cst = arith.constant 0.000000e+00 : f32
    %9 = vector.broadcast %cst : f32 to vector<8x256xf32>
    %10 = arith.maximumf %8, %9 : vector<8x256xf32>
    %cst_5 = arith.constant 0.000000e+00 : f32
    %11 = vector.broadcast %cst_5 : f32 to vector<8x256xf32>
    %12 = arith.cmpf ogt, %6, %11 : vector<8x256xf32>
    %cst_6 = arith.constant 1.000000e+00 : f32
    %13 = vector.broadcast %cst_6 : f32 to vector<8x256xf32>
    %14 = arith.select %12, %6, %13 : vector<8x256xi1>, vector<8x256xf32>
    %15 = tpu.reciprocal %14 : vector<8x256xf32> -> vector<8x256xf32>
    %16 = arith.mulf %10, %15 : vector<8x256xf32>
    %17 = arith.mulf %16, %0 : vector<8x256xf32>
    %18 = arith.select %12, %17, %10 : vector<8x256xi1>, vector<8x256xf32>
    %c0_7 = arith.constant 0 : index
    %c0_8 = arith.constant 0 : index
    %19 = vector.load %arg5[%c0_7, %c0_8] : memref<8x256xf32, #tpu.memory_space<vmem>>, vector<8x256xf32>
    tpu.vector_store %arg5[%c0_7, %c0_8], %18 {strides = array<i32>} : memref<8x256xf32, #tpu.memory_space<vmem>>, vector<8x256xf32>,
    %20 = arith.mulf %16, %1 : vector<8x256xf32>
    %cst_9 = arith.constant 0.000000e+00 : f32
    %21 = vector.broadcast %cst_9 : f32 to vector<8x256xf32>
    %22 = arith.select %12, %20, %21 : vector<8x256xi1>, vector<8x256xf32>
    %c0_10 = arith.constant 0 : index
    %c0_11 = arith.constant 0 : index
    %23 = vector.load %arg6[%c0_10, %c0_11] : memref<8x256xf32, #tpu.memory_space<vmem>>, vector<8x256xf32>
    tpu.vector_store %arg6[%c0_10, %c0_11], %22 {strides = array<i32>} : memref<8x256xf32, #tpu.memory_space<vmem>>, vector<8x256xf32>,
    return
  }
  func.func @transform_0(%arg0: i32, %arg1: i32) -> (i32, i32) {
    %c0_i32 = arith.constant 0 : i32
    return %arg0, %arg1 : i32, i32
  }
  func.func @transform_1(%arg0: i32, %arg1: i32) -> (i32, i32) {
    %c0_i32 = arith.constant 0 : i32
    return %arg0, %arg1 : i32, i32
  }
  func.func @transform_2(%arg0: i32, %arg1: i32) -> (i32, i32) {
    %c0_i32 = arith.constant 0 : i32
    %c0_i32_0 = arith.constant 0 : i32
    return %arg0, %c0_i32 : i32, i32
  }
  func.func @transform_3(%arg0: i32, %arg1: i32) -> (i32, i32) {
    %c0_i32 = arith.constant 0 : i32
    return %arg0, %arg1 : i32, i32
  }
  func.func @transform_4(%arg0: i32, %arg1: i32) -> (i32, i32) {
    %c0_i32 = arith.constant 0 : i32
    return %arg0, %arg1 : i32, i32
  }
}

</mosaic_0001>

<bundles_post_ra>
// kernel: tpu_custom_call.1
= control target key start
LH: loop header
LB: loop body
LE: loop exit
PB: predicated region body
PF: predicated region fallthrough
CT: control target
= control target key end

     0   :  { %10 = vsyncpa [#allocation3], 0  ;;  %s330_s0 = inlined_call_operand.hbm [shape: f32[8,256], index: 0, kind: input, shape index: {}]   ;;  %s331_s1 = inlined_call_operand.hbm [shape: f32[8,256], index: 1, kind: input, shape index: {}]   ;;  %s332_s2 = inlined_call_operand.vmem [shape: f32[8,1], index: 2, kind: input, shape index: {}]   ;;  %s333_s3 = inlined_call_operand.hbm [shape: f32[8,256], index: 3, kind: output, shape index: {0}]   ;;  %s334_s4 = inlined_call_operand.hbm [shape: f32[8,256], index: 4, kind: output, shape index: {1}]  }
   0x1   :  { %11 = vsyncpa [#allocation6], 0 }
   0x2   :  { %12 = vsyncpa [#allocation4], 0 }
   0x3   :  { %13 = vsyncpa [#allocation9], 0  ;;  %s236_s15 = smov [#allocation2]   ;;  %s237_s17 = smov [#allocation5]  }
   0x4   :  { %s20_s16 = sshll.u32 %s236_s15, 4  ;;  %s30_s18 = sshll.u32 %s237_s17, 4  ;;  %s21_s16 = int_to_ptr.vmem [resolvable:$true] %s20_s16  ;;  %s31_s18 = int_to_ptr.vmem [resolvable:$true] %s30_s18 }
   0x5   :  { %s140_s21 = scalar_lea.hbm %s330_s0, 256 }
   0x6   :  { %p141_p0 = scmp.ne.s32.totalorder %s330_s0, %s140_s21  ;;  %p144_p1 = scmp.lt.u32.totalorder %s140_s21, %s330_s0 }
   0x8   :  { %p146_p2 = pnand %p144_p1, %p141_p0 }
   0xa   :  { %149 = shalt.err (!%p146_p2)
}
   0xb   :  { %s150_s26 = scalar_lea.vmem %s21_s16, 256  ;;  %p155_p4 = scmp.lt.s32.totalorder %s21_s16, %s21_s16 }
   0xc   :  { %p151_p3 = scmp.ne.s32.totalorder %s21_s16, %s150_s26  ;;  %p156_p5 = scmp.lt.s32.totalorder %s150_s26, %s150_s26 }
   0xe   :  { %p157_p6 = por %p156_p5, %p155_p4 }
  0x10   :  { %p158_p7 = pnand %p157_p6, %p151_p3 }
  0x12   :  { %161 = shalt.err (!%p158_p7)
}
  0x13   :  { %23 = dma.hbm_to_vmem [thread:$0]  %s330_s0, 256, %s21_s16, [#allocation3]  }
  0x14   :  { %s162_s5 = scalar_lea.hbm %s331_s1, 256 }
  0x15   :  { %p163_p8 = scmp.ne.s32.totalorder %s331_s1, %s162_s5  ;;  %p166_p9 = scmp.lt.u32.totalorder %s162_s5, %s331_s1 }
  0x17   :  { %p168_p10 = pnand %p166_p9, %p163_p8 }
  0x19   :  { %171 = shalt.err (!%p168_p10)
}
  0x1a   :  { %s172_s10 = scalar_lea.vmem %s31_s18, 256  ;;  %p177_p12 = scmp.lt.s32.totalorder %s31_s18, %s31_s18 }
  0x1b   :  { %p173_p11 = scmp.ne.s32.totalorder %s31_s18, %s172_s10  ;;  %p178_p13 = scmp.lt.s32.totalorder %s172_s10, %s172_s10 }
  0x1d   :  { %p179_p0 = por %p178_p13, %p177_p12 }
  0x1f   :  { %p180_p1 = pnand %p179_p0, %p173_p11 }
  0x21   :  { %183 = shalt.err (!%p180_p1)
}
  0x22   :  { %33 = dma.hbm_to_vmem [thread:$0]  %s331_s1, 256, %s31_s18, [#allocation6]  }
  0x23   :  { %228 = dma.done.wait [#allocation3], 256  }
  0x24   :  { %229 = vsyncadd [#allocation3], 4294967040 }
  0x25   :  { %230 = dma.done.wait [#allocation6], 256  }
  0x26   :  { %231 = vsyncadd [#allocation6], 4294967040  ;;  %v238_v0 = vmov 0   ;;  %v46_v1 = vld [vmem:[%s332_s2] sm:$0xff]  ;;  %v44_v3 = vld [vmem:[#allocation5] sm:$0xff]  ;;  %s239_s1 = smov [#allocation7]  }
  0x27   :  { %131 = vset.pattern.permute.xlu0 %v238_v0  ;;  %v42_v2 = vld [vmem:[#allocation2] sm:$0xff]  ;;  %v43_v4 = vld [vmem:[#allocation2 + $0x8] sm:$0xff]  ;;  %v45_v5 = vld [vmem:[#allocation5 + $0x8] sm:$0xff]  ;;  %v49_v7 = vmul.f32 %v44_v3, %v44_v3  ;;  %s102_s2 = sshll.u32 %s239_s1, 4  ;;  %s240_s14 = smov [#allocation8]   ;;  %s103_s2 = int_to_ptr.vmem [resolvable:$true] %s102_s2 }
  0x28   :  { %69 = vperm.xlu0 %131, %v46_v1   ;;  %v47_v6 = vmul.f32 %v42_v2, %v42_v2  ;;  %v48_v8 = vmul.f32 %v43_v4, %v43_v4  ;;  %v50_v9 = vmul.f32 %v45_v5, %v45_v5  ;;  %s112_s15 = sshll.u32 %s240_s14, 4  ;;  %s184_s16 = scalar_lea.vmem %s103_s2, 256  ;;  %s299_s15 = int_to_ptr.vmem [resolvable:$true] %s112_s15 }
  0x29   :  { %p185_p2 = scmp.ne.s32.totalorder %s103_s2, %s184_s16  ;;  %p189_p3 = scmp.lt.s32.totalorder %s103_s2, %s103_s2 }
  0x2a   :  { %v51_v10 = vadd.f32 %v49_v7, %v47_v6  ;;  %v52_v11 = vadd.f32 %v50_v9, %v48_v8  ;;  %p190_p4 = scmp.lt.s32.totalorder %s184_s16, %s184_s16 }
  0x2c   :  { %132 = vrsqrt.f32 %v51_v10  ;;  %vm55_vm0 = vcmp.eq.f32.partialorder %v51_v10, inf  ;;  %vm62_vm1 = vcmp.eq.f32.partialorder %v52_v11, inf  ;;  %v58_v16 = vand.u32 2147483648, %v51_v10  ;;  %p191_p5 = por %p190_p4, %p189_p3 }
  0x2d   :  { %134 = vrsqrt.f32 %v52_v11  ;;  %vm57_vm2 = vcmp.eq.f32.partialorder %v51_v10, 0.0  ;;  %v65_v18 = vand.u32 2147483648, %v52_v11  ;;  %vm64_vm3 = vcmp.eq.f32.partialorder %v52_v11, 0.0 }
  0x2e   :  { %p192_p6 = pnand %p191_p5, %p185_p2 }
  0x36   :  { %v133_v12 = vpop.eup %132 }
  0x37   :  { %v135_v13 = vpop.eup %134  ;;  %v54_v14 = vmul.f32 %v133_v12, %v51_v10 }
  0x38   :  { %v61_v15 = vmul.f32 %v135_v13, %v52_v11 }
  0x39   :  { %v56_v17 = vsel %vm55_vm0, %v51_v10, %v54_v14 }
  0x3a   :  { %v63_v19 = vsel %vm62_vm1, %v52_v11, %v61_v15  ;;  %v59_v20 = vsel %vm57_vm2, %v58_v16, %v56_v17 }
  0x3b   :  { %v66_v21 = vsel %vm64_vm3, %v65_v18, %v63_v19  ;;  %vm76_vm4 = vcmp.gt.f32.partialorder %v59_v20, 0.0 }
  0x3c   :  { %vm77_vm5 = vcmp.gt.f32.partialorder %v66_v21, 0.0  ;;  %v78_v22 = vsel %vm76_vm4, %v59_v20, 1.0 }
  0x3d   :  { %v79_v23 = vsel %vm77_vm5, %v66_v21, 1.0  ;;  %136 = vrcp.f32 %v78_v22 }
  0x3e   :  { %138 = vrcp.f32 %v79_v23 }
  0x47   :  { %v137_v25 = vpop.eup %136 }
  0x48   :  { %v139_v28 = vpop.eup %138 }
  0xa7   :  { %v70_v24 = vpop.permute.xlu0 %69 }
  0xa8   :  { %v72_v26 = vadd.f32 %v70_v24, %v59_v20  ;;  %v73_v27 = vadd.f32 %v70_v24, %v66_v21 }
  0xaa   :  { %v74_v29 = vmax.f32 %v72_v26, 0.0  ;;  %v75_v30 = vmax.f32 %v73_v27, 0.0 }
  0xac   :  { %v82_v31 = vmul.f32 %v137_v25, %v74_v29  ;;  %v83_v32 = vmul.f32 %v139_v28, %v75_v30 }
  0xae   :  { %v84_v33 = vmul.f32 %v82_v31, %v42_v2  ;;  %v85_v34 = vmul.f32 %v83_v32, %v43_v4  ;;  %v90_v35 = vmul.f32 %v82_v31, %v44_v3  ;;  %v91_v36 = vmul.f32 %v83_v32, %v45_v5 }
  0xb0   :  { %v86_v37 = vsel %vm76_vm4, %v84_v33, %v74_v29  ;;  %v87_v38 = vsel %vm77_vm5, %v85_v34, %v75_v30  ;;  %v92_v39 = vsel %vm76_vm4, %v90_v35, 0.0  ;;  %v93_v40 = vsel %vm77_vm5, %v91_v36, 0.0 }
  0xb1   :  { %88 = vst [vmem:[#allocation7] sm:$0xff] %v86_v37  ;;  %89 = vst [vmem:[#allocation7 + $0x8] sm:$0xff] %v87_v38 }
  0xb2   :  { %94 = vst [vmem:[#allocation8] sm:$0xff] %v92_v39  ;;  %95 = vst [vmem:[#allocation8 + $0x8] sm:$0xff] %v93_v40 }
  0xb3   :  { %195 = shalt.err (!%p192_p6)
}
  0xb4   :  { %s196_s19 = scalar_lea.hbm %s333_s3, 256 }
  0xb5   :  { %p197_p7 = scmp.ne.s32.totalorder %s333_s3, %s196_s19  ;;  %p200_p8 = scmp.lt.u32.totalorder %s196_s19, %s333_s3 }
  0xb7   :  { %p202_p9 = pnand %p200_p8, %p197_p7 }
  0xb9   :  { %205 = shalt.err (!%p202_p9)
}
  0xba   :  { %105 = dma.vmem_to_hbm [thread:$0]  %s103_s2, 256, %s333_s3, [#allocation4]  }
  0xbb   :  { %s206_s26 = scalar_lea.vmem %s299_s15, 256  ;;  %p211_p11 = scmp.lt.s32.totalorder %s299_s15, %s299_s15 }
  0xbc   :  { %p207_p10 = scmp.ne.s32.totalorder %s299_s15, %s206_s26  ;;  %p212_p12 = scmp.lt.s32.totalorder %s206_s26, %s206_s26 }
  0xbe   :  { %p213_p13 = por %p212_p12, %p211_p11 }
  0xc0   :  { %p214_p0 = pnand %p213_p13, %p207_p10 }
  0xc2   :  { %217 = shalt.err (!%p214_p0)
}
  0xc3   :  { %s218_s29 = scalar_lea.hbm %s334_s4, 256 }
  0xc4   :  { %p219_p1 = scmp.ne.s32.totalorder %s334_s4, %s218_s29  ;;  %p222_p2 = scmp.lt.u32.totalorder %s218_s29, %s334_s4 }
  0xc6   :  { %p224_p3 = pnand %p222_p2, %p219_p1 }
  0xc8   :  { %227 = shalt.err (!%p224_p3)
}
  0xc9   :  { %115 = dma.vmem_to_hbm [thread:$0]  %s299_s15, 256, %s334_s4, [#allocation9]  }
  0xca   :  { %232 = dma.done.wait [#allocation4], 256  }
  0xcb   :  { %233 = vsyncadd [#allocation4], 4294967040 }
  0xcc   :  { %234 = dma.done.wait [#allocation9], 256  }
  0xcd   :  { %235 = vsyncadd [#allocation9], 4294967040 }
  0xce   :  { %122 = vsyncpa [#allocation3], 1 }
  0xcf   :  { %123 = vsyncpa [#allocation6], 1 }
  0xd0   :  { %124 = vsyncpa [#allocation4], 1 }
  0xd1   :  { %125 = vsyncpa [#allocation9], 1 }

</bundles_post_ra>
